<compile_context>
chip_gen: v7x
topology: tpu7x:2x2x1
jax: 0.10.0
libtpu: 0.0.40
codegen_flags: <defaults>
</compile_context>

<pallas_src>
import functools
import math

import jax
import jax.numpy as jnp
from jax import lax
from jax.experimental import pallas as pl
from jax.experimental.pallas import tpu as pltpu

_LOG2E = 1.4426950408889634


def _attn_body(q_ref, k_ref, v_ref, bias_row, o_ref,
               m_sc, l_sc, acc_sc, qs_sc, *, scale):
    """One (batch, q-tile, kv-tile) grid step of online-softmax attention."""
    kv = pl.program_id(2)

    @pl.when(kv == 0)
    def _():
        m_sc[...] = jnp.full_like(m_sc, -jnp.inf)
        l_sc[...] = jnp.zeros_like(l_sc)
        acc_sc[...] = jnp.zeros_like(acc_sc)
        # Fold log2(e)/sqrt(d_k) into q once per q tile (f32 multiply, stored
        # back in the compute dtype) instead of re-scaling every kv step.
        qs_sc[...] = (q_ref[0].astype(jnp.float32) * scale).astype(qs_sc.dtype)

    q = qs_sc[...]               # (tq, D), already * log2e/sqrt(d_k)
    k = k_ref[0]                 # (tk, D)
    v = v_ref[0]                 # (tk, D)

    # QK^T without materializing k.T: contract last dims on the MXU, f32 acc.
    s = lax.dot_general(q, k, (((1,), (1,)), ((), ())),
                        preferred_element_type=jnp.float32)   # (tq, tk), base-2 domain

    if bias_row is not None:
        # Additive masked_fill bias (already scaled by log2e): one add per
        # element instead of a compare + select.
        s = s + bias_row         # (1, tk) broadcast over (tq, tk)

    # Online softmax update (base-2 domain, exp2 on the EUP).
    m_prev = m_sc[...]                                        # (tq, 1)
    m_new = jnp.maximum(m_prev, jnp.max(s, axis=-1, keepdims=True))
    alpha = jnp.exp2(m_prev - m_new)                          # (tq, 1)
    p = jnp.exp2(s - m_new)                                   # (tq, tk) f32
    l_sc[...] = alpha * l_sc[...] + jnp.sum(p, axis=-1, keepdims=True)
    acc_sc[...] = alpha * acc_sc[...] + jnp.dot(
        p.astype(v.dtype), v, preferred_element_type=jnp.float32)
    m_sc[...] = m_new

    @pl.when(kv == pl.num_programs(2) - 1)
    def _():
        l = l_sc[...]
        inv_l = pl.reciprocal(l, approx=True)   # EUP slot, not a VALU divide
        inv_l = inv_l * (2.0 - l * inv_l)       # one Newton step -> ~f32 accurate
        o_ref[0] = (acc_sc[...] * inv_l).astype(o_ref.dtype)


def _sdpa_kernel_masked(q_ref, k_ref, v_ref, bias_ref, o_ref,
                        m_sc, l_sc, acc_sc, qs_sc, *, scale):
    _attn_body(q_ref, k_ref, v_ref, bias_ref[0], o_ref,
               m_sc, l_sc, acc_sc, qs_sc, scale=scale)


def _sdpa_kernel_nomask(q_ref, k_ref, v_ref, o_ref,
                        m_sc, l_sc, acc_sc, qs_sc, *, scale):
    _attn_body(q_ref, k_ref, v_ref, None, o_ref,
               m_sc, l_sc, acc_sc, qs_sc, scale=scale)


def _pick_tile(s, preferred):
    for t in preferred:
        if s % t == 0:
            return t
    return s   # fall back to the full (untiled) extent


def _default_tiles(S):
    # Large tiles amortize the ~0.35 us per-grid-step overhead and maximize
    # K/V reuse per HBM byte (arithmetic intensity ~ 2*tq/itemsize flops/byte,
    # so tq is the roofline lever, esp. on v6e).
    tq = _pick_tile(S, (1024, 512, 256, 128))
    tk = _pick_tile(S, (2048, 1024, 512, 256, 128))
    # Bound the f32 (tq, tk) score/prob temporaries so the kernel fits v7x's
    # 64 MiB VMEM with headroom (cap tq*tk <= 1M elements, ~4 MiB per temp).
    while tq * tk > (1 << 20) and tk % 256 == 0 and S % (tk // 2) == 0:
        tk //= 2
    while tq * tk > (1 << 20) and tq % 256 == 0 and S % (tq // 2) == 0:
        tq //= 2
    return tq, tk


def scaled_dot_product_attention(q, k, v, mask=None, *, tq=None, tk=None,
                                 kv_buffers=None):
    """Pallas TPU implementation of ScaledDotProductAttention.forward.

    q, k, v: (B, S, D). mask: optional (B, 1, S); positions where mask == 0
    receive a -1e9 additive bias before the softmax (PyTorch masked_fill
    semantics; a *fully* masked row differs from the reference only in that
    it softmaxes the shifted raw scores instead of a uniform -1e9 row).

    bf16 q/k/v are supported and recommended: both matmuls then take the
    native bf16 MXU path with f32 accumulation and K/V HBM traffic halves.
    """
    B, S, D = q.shape
    scale = _LOG2E / math.sqrt(D)

    dt_q, dt_k = _default_tiles(S)
    tq = tq if tq is not None else dt_q
    tk = tk if tk is not None else dt_k
    assert S % tq == 0 and S % tk == 0

    grid = (B, S // tq, S // tk)

    def kv_spec(index_map):
        if kv_buffers is None:
            return pl.BlockSpec((1, tk, D), index_map)
        # Optional deeper prefetch on the reduction axis if K/V DMA is exposed.
        return pl.BlockSpec((1, tk, D), index_map,
                            pipeline_mode=pl.Buffered(kv_buffers))

    q_spec = pl.BlockSpec((1, tq, D), lambda b, qi, ki: (b, qi, 0))
    k_spec = kv_spec(lambda b, qi, ki: (b, ki, 0))
    v_spec = kv_spec(lambda b, qi, ki: (b, ki, 0))
    # Output block is constant along the kv (reduction) axis -> resident
    # accumulator output, written once at the last kv step.
    o_spec = pl.BlockSpec((1, tq, D), lambda b, qi, ki: (b, qi, 0))

    scratch = [
        pltpu.VMEM((tq, 1), jnp.float32),   # running row max m (base-2 domain)
        pltpu.VMEM((tq, 1), jnp.float32),   # running denominator l
        pltpu.VMEM((tq, D), jnp.float32),   # f32 output accumulator
        pltpu.VMEM((tq, D), q.dtype),       # pre-scaled q, reused across kv steps
    ]

    compiler_params = pltpu.CompilerParams(
        dimension_semantics=("parallel", "parallel", "arbitrary"),
        # v7x has only 64 MiB physical VMEM per core; stay <= ~48 MiB.
        vmem_limit_bytes=48 * 1024 * 1024,
    )

    if mask is None:
        # Separate no-mask variant: no dummy mask DMA, no add in the kernel.
        kernel = functools.partial(_sdpa_kernel_nomask, scale=scale)
        in_specs = [q_spec, k_spec, v_spec]
        args = (q, k, v)
    else:
        # Precompute the additive bias once in the wrapper, already in the
        # base-2 (log2e-scaled) domain used by the in-kernel exp2 softmax.
        bias = jnp.where(mask == 0,
                         jnp.float32(-1e9 * _LOG2E), jnp.float32(0.0))
        kernel = functools.partial(_sdpa_kernel_masked, scale=scale)
        bias_spec = pl.BlockSpec((1, 1, tk), lambda b, qi, ki: (b, 0, ki))
        in_specs = [q_spec, k_spec, v_spec, bias_spec]
        args = (q, k, v, bias)

    # TODO(synk): for production multi-head shapes, process H heads per grid
    # step and present a lane-dense (tq, H*Dh >= 128) output slab; this
    # single-head module keeps the output/accumulator last dim at D.
    return pl.pallas_call(
        kernel,
        out_shape=jax.ShapeDtypeStruct((B, S, D), q.dtype),
        grid_spec=pltpu.PrefetchScalarGridSpec(
            num_scalar_prefetch=0,
            grid=grid,
            in_specs=in_specs,
            out_specs=o_spec,
            scratch_shapes=scratch,
        ),
        compiler_params=compiler_params,
    )(*args)


def _reference(q, k, v, mask=None):
    d_k = q.shape[-1]
    scores = jnp.einsum("bqd,bkd->bqk",
                        q.astype(jnp.float32), k.astype(jnp.float32)) / math.sqrt(d_k)
    if mask is not None:
        scores = jnp.where(mask == 0, -1e9, scores)
    probs = jax.nn.softmax(scores, axis=-1)
    return jnp.einsum("bqk,bkd->bqd", probs, v.astype(jnp.float32))


if __name__ == "__main__":
    key = jax.random.PRNGKey(0)

    # --- Small shapes matching the module's toy configuration. ---
    B, S, D = 2, 8, 32
    kq, kk, kv_, _ = jax.random.split(key, 4)
    q = jax.random.normal(kq, (B, S, D), dtype=jnp.float32)
    k = jax.random.normal(kk, (B, S, D), dtype=jnp.float32)
    v = jax.random.normal(kv_, (B, S, D), dtype=jnp.float32)
    mask = jnp.ones((B, 1, S), dtype=jnp.float32)
    mask = mask.at[1, 0, S - 3:].set(0.0)

    out = jax.block_until_ready(scaled_dot_product_attention(q, k, v, mask))
    ref = _reference(q, k, v, mask)
    assert out.shape == (B, S, D)
    assert jnp.allclose(out, ref, atol=1e-4, rtol=1e-4), "masked path mismatch"

    out_nm = jax.block_until_ready(scaled_dot_product_attention(q, k, v, None))
    ref_nm = _reference(q, k, v, None)
    assert jnp.allclose(out_nm, ref_nm, atol=1e-4, rtol=1e-4), "no-mask path mismatch"

    # --- Moderate shape with default (large) tiles. ---
    B2, S2, D2 = 2, 512, 64
    k2q, k2k, k2v, _ = jax.random.split(jax.random.PRNGKey(0), 4)
    q2 = jax.random.normal(k2q, (B2, S2, D2), dtype=jnp.float32)
    k2 = jax.random.normal(k2k, (B2, S2, D2), dtype=jnp.float32)
    v2 = jax.random.normal(k2v, (B2, S2, D2), dtype=jnp.float32)
    mask2 = jnp.ones((B2, 1, S2), dtype=jnp.float32)
    mask2 = mask2.at[0, 0, S2 - 17:].set(0.0)
    ref2 = _reference(q2, k2, v2, mask2)

    out2 = jax.block_until_ready(scaled_dot_product_attention(q2, k2, v2, mask2))
    assert jnp.allclose(out2, ref2, atol=1e-4, rtol=1e-4), "default-tile path mismatch"

    # --- Same shape, small forced tiles: exercises multi-step online softmax. ---
    out2t = jax.block_until_ready(
        scaled_dot_product_attention(q2, k2, v2, mask2, tq=128, tk=128))
    assert jnp.allclose(out2t, ref2, atol=1e-4, rtol=1e-4), "tiled path mismatch"

    # --- bf16 inputs: native bf16 MXU path with f32 accumulation. ---
    qb, kb, vb = (x.astype(jnp.bfloat16) for x in (q2, k2, v2))
    outb = jax.block_until_ready(
        scaled_dot_product_attention(qb, kb, vb, mask2, tq=128, tk=128))
    refb = _reference(qb, kb, vb, mask2)
    assert jnp.allclose(outb.astype(jnp.float32), refb, atol=3e-2, rtol=3e-2), \
        "bf16 path mismatch"

    print("KERNEL_OK")
</pallas_src>

<mosaic_0001>
module attributes {stable_mosaic.version = 11 : i64} {
  func.func @_sdpa_kernel_masked(%arg0: i32, %arg1: i32, %arg2: i32, %arg3: memref<1x8x32xf32, #tpu.memory_space<vmem>>, %arg4: memref<1x8x32xf32, #tpu.memory_space<vmem>>, %arg5: memref<1x8x32xf32, #tpu.memory_space<vmem>>, %arg6: memref<1x1x8xf32, #tpu.memory_space<vmem>>, %arg7: memref<1x8x32xf32, #tpu.memory_space<vmem>>, %arg8: memref<8x1xf32, #tpu.memory_space<vmem>>, %arg9: memref<8x1xf32, #tpu.memory_space<vmem>>, %arg10: memref<8x32xf32, #tpu.memory_space<vmem>>, %arg11: memref<8x32xf32, #tpu.memory_space<vmem>>) attributes {dimension_semantics = [#tpu.dimension_semantics<parallel>, #tpu.dimension_semantics<parallel>, #tpu.dimension_semantics<arbitrary>], iteration_bounds = array<i64: 2, 1, 1>, scalar_prefetch = 0 : i64, scratch_operands = 4 : i64, tpu.core_type = #tpu.core_type<tc>, window_params = [{transform_indices = @transform_0, window_bounds = array<i64: 1, 8, 32>}, {transform_indices = @transform_1, window_bounds = array<i64: 1, 8, 32>}, {transform_indices = @transform_2, window_bounds = array<i64: 1, 8, 32>}, {transform_indices = @transform_3, window_bounds = array<i64: 1, 1, 8>}, {transform_indices = @transform_4, window_bounds = array<i64: 1, 8, 32>}]} {
    %c0 = arith.constant 0 : index
    %c0_0 = arith.constant 0 : index
    %c0_1 = arith.constant 0 : index
    %0 = vector.load %arg6[%c0, %c0_0, %c0_1] : memref<1x1x8xf32, #tpu.memory_space<vmem>>, vector<1x1x8xf32>
    %1 = vector.shape_cast %0 : vector<1x1x8xf32> to vector<1x8xf32>
    %c0_i32 = arith.constant 0 : i32
    %2 = arith.cmpi eq, %arg2, %c0_i32 : i32
    %3 = arith.extui %2 : i1 to i32
    %c0_i32_2 = arith.constant 0 : i32
    %4 = arith.cmpi ne, %3, %c0_i32_2 : i32
    scf.if %4 {
      %cst_28 = arith.constant 0xFF800000 : f32
      %38 = vector.broadcast %cst_28 : f32 to vector<8x1xf32>
      %c0_29 = arith.constant 0 : index
      %c0_30 = arith.constant 0 : index
      %39 = vector.load %arg8[%c0_29, %c0_30] : memref<8x1xf32, #tpu.memory_space<vmem>>, vector<8x1xf32>
      tpu.vector_store %arg8[%c0_29, %c0_30], %38 {strides = array<i32>} : memref<8x1xf32, #tpu.memory_space<vmem>>, vector<8x1xf32>,
      %cst_31 = arith.constant 0.000000e+00 : f32
      %40 = vector.broadcast %cst_31 : f32 to vector<8x1xf32>
      %c0_32 = arith.constant 0 : index
      %c0_33 = arith.constant 0 : index
      %41 = vector.load %arg9[%c0_32, %c0_33] : memref<8x1xf32, #tpu.memory_space<vmem>>, vector<8x1xf32>
      tpu.vector_store %arg9[%c0_32, %c0_33], %40 {strides = array<i32>} : memref<8x1xf32, #tpu.memory_space<vmem>>, vector<8x1xf32>,
      %cst_34 = arith.constant 0.000000e+00 : f32
      %42 = vector.broadcast %cst_34 : f32 to vector<8x32xf32>
      %c0_35 = arith.constant 0 : index
      %c0_36 = arith.constant 0 : index
      %43 = vector.load %arg10[%c0_35, %c0_36] : memref<8x32xf32, #tpu.memory_space<vmem>>, vector<8x32xf32>
      tpu.vector_store %arg10[%c0_35, %c0_36], %42 {strides = array<i32>} : memref<8x32xf32, #tpu.memory_space<vmem>>, vector<8x32xf32>,
      %c0_37 = arith.constant 0 : index
      %c0_38 = arith.constant 0 : index
      %c0_39 = arith.constant 0 : index
      %44 = vector.load %arg3[%c0_37, %c0_38, %c0_39] : memref<1x8x32xf32, #tpu.memory_space<vmem>>, vector<1x8x32xf32>
      %45 = vector.shape_cast %44 : vector<1x8x32xf32> to vector<8x32xf32>
      %cst_40 = arith.constant 0.255034864 : f32
      %46 = vector.broadcast %cst_40 : f32 to vector<8x32xf32>
      %47 = arith.mulf %45, %46 : vector<8x32xf32>
      %c0_41 = arith.constant 0 : index
      %c0_42 = arith.constant 0 : index
      %48 = vector.load %arg11[%c0_41, %c0_42] : memref<8x32xf32, #tpu.memory_space<vmem>>, vector<8x32xf32>
      tpu.vector_store %arg11[%c0_41, %c0_42], %47 {strides = array<i32>} : memref<8x32xf32, #tpu.memory_space<vmem>>, vector<8x32xf32>,
    } else {
    }
    %c0_3 = arith.constant 0 : index
    %c0_4 = arith.constant 0 : index
    %5 = vector.load %arg11[%c0_3, %c0_4] : memref<8x32xf32, #tpu.memory_space<vmem>>, vector<8x32xf32>
    %c0_5 = arith.constant 0 : index
    %c0_6 = arith.constant 0 : index
    %c0_7 = arith.constant 0 : index
    %6 = vector.load %arg4[%c0_5, %c0_6, %c0_7] : memref<1x8x32xf32, #tpu.memory_space<vmem>>, vector<1x8x32xf32>
    %7 = vector.shape_cast %6 : vector<1x8x32xf32> to vector<8x32xf32>
    %c0_8 = arith.constant 0 : index
    %c0_9 = arith.constant 0 : index
    %c0_10 = arith.constant 0 : index
    %8 = vector.load %arg5[%c0_8, %c0_9, %c0_10] : memref<1x8x32xf32, #tpu.memory_space<vmem>>, vector<1x8x32xf32>
    %9 = vector.shape_cast %8 : vector<1x8x32xf32> to vector<8x32xf32>
    %cst = arith.constant dense<0.000000e+00> : vector<8x8xf32>
    %10 = tpu.matmul %5, %7, %cst {dimension_numbers = #tpu.dot_dimension_numbers<[1], [1], [0], [0], [0, 0, 1, 0], [], []>} : vector<8x32xf32>, vector<8x32xf32>, vector<8x8xf32> -> vector<8x8xf32>
    %11 = vector.broadcast %1 : vector<1x8xf32> to vector<8x8xf32>
    %12 = arith.addf %10, %11 : vector<8x8xf32>
    %c0_11 = arith.constant 0 : index
    %c0_12 = arith.constant 0 : index
    %13 = vector.load %arg8[%c0_11, %c0_12] : memref<8x1xf32, #tpu.memory_space<vmem>>, vector<8x1xf32>
    %cst_13 = arith.constant dense<0xFF800000> : vector<8xf32>
    %14 = vector.multi_reduction <maximumf>, %12, %cst_13 [1] : vector<8x8xf32> to vector<8xf32>
    %15 = vector.shape_cast %14 : vector<8xf32> to vector<8x1xf32>
    %16 = arith.maximumf %13, %15 : vector<8x1xf32>
    %17 = arith.subf %13, %16 : vector<8x1xf32>
    %18 = math.exp2 %17 : vector<8x1xf32>
    %19 = vector.broadcast %16 : vector<8x1xf32> to vector<8x8xf32>
    %20 = arith.subf %12, %19 : vector<8x8xf32>
    %21 = math.exp2 %20 : vector<8x8xf32>
    %c0_14 = arith.constant 0 : index
    %c0_15 = arith.constant 0 : index
    %22 = vector.load %arg9[%c0_14, %c0_15] : memref<8x1xf32, #tpu.memory_space<vmem>>, vector<8x1xf32>
    %23 = arith.mulf %18, %22 : vector<8x1xf32>
    %cst_16 = arith.constant dense<0.000000e+00> : vector<8xf32>
    %24 = vector.multi_reduction <add>, %21, %cst_16 [1] : vector<8x8xf32> to vector<8xf32>
    %25 = vector.shape_cast %24 : vector<8xf32> to vector<8x1xf32>
    %26 = arith.addf %23, %25 : vector<8x1xf32>
    %c0_17 = arith.constant 0 : index
    %c0_18 = arith.constant 0 : index
    %27 = vector.load %arg9[%c0_17, %c0_18] : memref<8x1xf32, #tpu.memory_space<vmem>>, vector<8x1xf32>
    tpu.vector_store %arg9[%c0_17, %c0_18], %26 {strides = array<i32>} : memref<8x1xf32, #tpu.memory_space<vmem>>, vector<8x1xf32>,
    %c0_19 = arith.constant 0 : index
    %c0_20 = arith.constant 0 : index
    %28 = vector.load %arg10[%c0_19, %c0_20] : memref<8x32xf32, #tpu.memory_space<vmem>>, vector<8x32xf32>
    %29 = vector.broadcast %18 : vector<8x1xf32> to vector<8x32xf32>
    %30 = arith.mulf %29, %28 : vector<8x32xf32>
    %cst_21 = arith.constant dense<0.000000e+00> : vector<8x32xf32>
    %31 = tpu.matmul %21, %9, %cst_21 {dimension_numbers = #tpu.dot_dimension_numbers<[1], [0], [0], [1], [0, 0, 1, 1], [], []>} : vector<8x8xf32>, vector<8x32xf32>, vector<8x32xf32> -> vector<8x32xf32>
    %32 = arith.addf %30, %31 : vector<8x32xf32>
    %c0_22 = arith.constant 0 : index
    %c0_23 = arith.constant 0 : index
    %33 = vector.load %arg10[%c0_22, %c0_23] : memref<8x32xf32, #tpu.memory_space<vmem>>, vector<8x32xf32>
    tpu.vector_store %arg10[%c0_22, %c0_23], %32 {strides = array<i32>} : memref<8x32xf32, #tpu.memory_space<vmem>>, vector<8x32xf32>,
    %c0_24 = arith.constant 0 : index
    %c0_25 = arith.constant 0 : index
    %34 = vector.load %arg8[%c0_24, %c0_25] : memref<8x1xf32, #tpu.memory_space<vmem>>, vector<8x1xf32>
    tpu.vector_store %arg8[%c0_24, %c0_25], %16 {strides = array<i32>} : memref<8x1xf32, #tpu.memory_space<vmem>>, vector<8x1xf32>,
    %c0_i32_26 = arith.constant 0 : i32
    %35 = arith.cmpi eq, %arg2, %c0_i32_26 : i32
    %36 = arith.extui %35 : i1 to i32
    %c0_i32_27 = arith.constant 0 : i32
    %37 = arith.cmpi ne, %36, %c0_i32_27 : i32
    scf.if %37 {
      %c0_28 = arith.constant 0 : index
      %c0_29 = arith.constant 0 : index
      %38 = vector.load %arg9[%c0_28, %c0_29] : memref<8x1xf32, #tpu.memory_space<vmem>>, vector<8x1xf32>
      %39 = tpu.reciprocal %38 {approx = true} : vector<8x1xf32> -> vector<8x1xf32>
      %40 = arith.mulf %38, %39 : vector<8x1xf32>
      %cst_30 = arith.constant 2.000000e+00 : f32
      %41 = vector.broadcast %cst_30 : f32 to vector<8x1xf32>
      %42 = arith.subf %41, %40 : vector<8x1xf32>
      %43 = arith.mulf %39, %42 : vector<8x1xf32>
      %c0_31 = arith.constant 0 : index
      %c0_32 = arith.constant 0 : index
      %44 = vector.load %arg10[%c0_31, %c0_32] : memref<8x32xf32, #tpu.memory_space<vmem>>, vector<8x32xf32>
      %45 = vector.broadcast %43 : vector<8x1xf32> to vector<8x32xf32>
      %46 = arith.mulf %44, %45 : vector<8x32xf32>
      %c0_33 = arith.constant 0 : index
      %c0_34 = arith.constant 0 : index
      %c0_35 = arith.constant 0 : index
      %47 = vector.load %arg7[%c0_33, %c0_34, %c0_35] : memref<1x8x32xf32, #tpu.memory_space<vmem>>, vector<1x8x32xf32>
      %48 = vector.shape_cast %47 : vector<1x8x32xf32> to vector<8x32xf32>
      %49 = vector.shape_cast %46 : vector<8x32xf32> to vector<1x8x32xf32>
      tpu.vector_store %arg7[%c0_33, %c0_34, %c0_35], %49 {strides = array<i32>} : memref<1x8x32xf32, #tpu.memory_space<vmem>>, vector<1x8x32xf32>,
    } else {
    }
    return
  }
  func.func @transform_0(%arg0: i32, %arg1: i32, %arg2: i32) -> (i32, i32, i32) {
    %c0_i32 = arith.constant 0 : i32
    %c0_i32_0 = arith.constant 0 : i32
    return %arg0, %arg1, %c0_i32 : i32, i32, i32
  }
  func.func @transform_1(%arg0: i32, %arg1: i32, %arg2: i32) -> (i32, i32, i32) {
    %c0_i32 = arith.constant 0 : i32
    %c0_i32_0 = arith.constant 0 : i32
    return %arg0, %arg2, %c0_i32 : i32, i32, i32
  }
  func.func @transform_2(%arg0: i32, %arg1: i32, %arg2: i32) -> (i32, i32, i32) {
    %c0_i32 = arith.constant 0 : i32
    %c0_i32_0 = arith.constant 0 : i32
    return %arg0, %arg2, %c0_i32 : i32, i32, i32
  }
  func.func @transform_3(%arg0: i32, %arg1: i32, %arg2: i32) -> (i32, i32, i32) {
    %c0_i32 = arith.constant 0 : i32
    %c0_i32_0 = arith.constant 0 : i32
    return %arg0, %c0_i32, %arg2 : i32, i32, i32
  }
  func.func @transform_4(%arg0: i32, %arg1: i32, %arg2: i32) -> (i32, i32, i32) {
    %c0_i32 = arith.constant 0 : i32
    %c0_i32_0 = arith.constant 0 : i32
    return %arg0, %arg1, %c0_i32 : i32, i32, i32
  }
}

</mosaic_0001>

<bundles_post_ra>
// kernel: tpu_custom_call.1
= control target key start
LH: loop header
LB: loop body
LE: loop exit
PB: predicated region body
PF: predicated region fallthrough
CT: control target
= control target key end

     0   :  { %s1329_s0 = inlined_call_operand.hbm [shape: f32[2,8,32], index: 0, kind: input, shape index: {}]   ;;  %s1330_s1 = inlined_call_operand.hbm [shape: f32[2,8,32], index: 1, kind: input, shape index: {}]   ;;  %s1331_s2 = inlined_call_operand.hbm [shape: f32[2,8,32], index: 2, kind: input, shape index: {}]   ;;  %s1332_s3 = inlined_call_operand.vmem [shape: f32[2,1,8], index: 3, kind: input, shape index: {}]   ;;  %s1333_s4 = inlined_call_operand.hbm [shape: f32[2,8,32], index: 4, kind: output, shape index: {}]  }
   0x1   :  { %1342 = sst [smem:[#allocation20_spill]] %s1330_s1 }
   0x2   :  { %9 = vsyncpa [#allocation7], 0 }
   0x3   :  { %11 = vsyncpa [#allocation7 + $0x1], 0 }
   0x4   :  { %12 = vsyncpa [#allocation10], 0 }
   0x5   :  { %14 = vsyncpa [#allocation10 + $0x1], 0 }
   0x6   :  { %15 = vsyncpa [#allocation8], 0 }
   0x7   :  { %17 = vsyncpa [#allocation8 + $0x1], 0  ;;  %s1047_s15 = smov 0   ;;  %s1049_s16 = smov 0  }
   0x8   :  { %s1051_s17 = smov 0   ;;  %s1053_s18 = smov 0  }
   0x9   :  { %s1055_s19 = smov 0   ;;  %s1057_s20 = smov 0  }
   0xa LB: > { %1343 = sst [smem:[#allocation16_spill]] %s1008_s19  ;;  %s1078_s21 = sadd.s32 4294967295, %s1012_s20   ;;  %s1012_s20 = sphi %s1057_s20, %s23_s20   ;;  %s1008_s19 = sphi %s1055_s19, %s1367_s19   ;;  %s1004_s18 = sphi %s1053_s18, %s1366_s18   ;;  %s1000_s17 = sphi %s1051_s17, %s1370_s17   ;;  %s996_s16 = sphi %s1049_s16, %s1369_s16   ;;  %s992_s15 = sphi %s1047_s15, %s1368_s15  }
   0xb   : > { %1344 = sst [smem:[#allocation17_spill]] %s1012_s20  ;;  %s716_s22 = sadd.s32 4294967294, %s1012_s20  }
   0xc   : > { %s42_s23 = sadd.s32 1, %s1008_s19  ;;  %s51_s24 = sadd.s32 1, %s1000_s17 }
   0xd   : > { %p44_p0 = scmp.ge.s32.totalorder %s42_s23, 2  ;;  %p58_p1 = scmp.ne.s32.totalorder %s1000_s17, %s996_s16 }
   0xe   : > { %p59_p2 = scmp.eq.s32.totalorder %s1012_s20, 0  ;;  %p64_p3 = scmp.ne.s32.totalorder %s996_s16, %s992_s15 }
   0xf   : > { %s1372_s23 = smov (%p44_p0, %s42_s23), 0  ;;  %p65_p5 = scmp.eq.s32.totalorder %s1078_s21, 0 }
  0x10   : > { %1345 = sst [smem:[#allocation18_spill]] %s1372_s23  ;;  %p1090_p4 = por %p59_p2, %p58_p1 }
  0x11   : > { %s46_s26 = ssub.s32 %s1008_s19, %s1372_s23  ;;  %p174_p6 = scmp.eq.s32.totalorder %s1078_s21, 1 }
  0x12   : > { %p49_p7 = scmp.eq.s32.totalorder %s46_s26, 0  ;;  %p1098_p8 = por %p65_p5, %p64_p3 }
  0x13   : > { %p1102_p9 = por %p174_p6, %p58_p1  ;;  %p180_p10 = scmp.eq.s32.totalorder %s716_s22, 1 }
  0x14   : > { %s1347_s27 = scalar_select %p1098_p8, 1, 0 }
  0x15   : > { %s1348_s28 = scalar_select %p1102_p9, 1, 0 }
  0x16   : > { %s1107_s29 = scalar_select %p49_p7, %s1000_s17, %s51_s24  }
  0x17   : > { %p1109_p11 = por %p180_p10, %p64_p3  ;;  %p774_p13 = scmp.lt.s32.totalorder %s1012_s20, 2 }
  0x18   : > { %1349 = sst [smem:[#allocation19_spill]] %s1107_s29  ;;  %s1334_s5 = sand.u32 1, %s1000_s17  }
  0x19   : > { %s1350_s30 = scalar_select %p1109_p11, 1, 0 }
  0x1a   : > { %s1118_s6 = sshll.u32 %s1334_s5, 3  ;;  %s1121_s7 = sshll.u32 %s1008_s19, 7 }
  0x1b   : > { %p1125_p0 = pnand %p774_p13, %p1090_p4  ;;  %s219_s9 = sand.u32 1, %s1012_s20  }
  0x1c   : > { %s1352_s1 = sld [smem:[#allocation20_spill]]  ;;  %s223_s13 = scalar_lea.vmem [#allocation9], %s1118_s6 }
  0x1d   : > { %s1351_s8 = scalar_select %p1125_p0, 1, 0 }
  0x1e   : > { %s231_s14 = sshll.u32 %s223_s13, 4  ;;  %s1141_s22 = scalar_lea.sflag [#allocation10], %s219_s9  ;;  %s1138_s14 = int_to_ptr.vmem [resolvable:$true] %s231_s14 }
  0x1f   : > { %p1147_p4 = pneg %p1125_p0 }
  0x22   : > { %s1134_s12 = scalar_lea.hbm %s1352_s1, %s1121_s7  ;;  %s841_s11 = scalar_lea.hbm %s1352_s1, 256 }
  0x23   : > { %s836_s24 = scalar_lea.hbm %s1134_s12, 128  ;;  %p842_p7 = scmp.lt.u32.totalorder %s1134_s12, %s1352_s1 }
  0x24   : > { %p837_p3 = scmp.ne.s32.totalorder %s1134_s12, %s836_s24  ;;  %p843_p10 = scmp.lt.u32.totalorder %s841_s11, %s836_s24 }
  0x25   : > { %p845_p12 = scmp.lt.u32.totalorder %s836_s24, %s1134_s12 }
  0x26   : > { %p839_p5 = pnand %p1147_p4, %p837_p3  ;;  %p844_p13 = por %p843_p10, %p842_p7 }
  0x28   : > { %p840_p6 = pneg %p839_p5  ;;  %p846_p1 = por %p845_p12, %p844_p13 }
  0x2a   : > { %p847_p2 = pnand %p846_p1, %p840_p6 }
  0x2c   : > { %850 = shalt.err (!%p847_p2)
}
  0x2d   : > { %s851_s9 = scalar_lea.vmem %s1138_s14, 128  ;;  %s1014_s26 = smov [#allocation9]  }
  0x2e   : > { %p852_p3 = scmp.ne.s32.totalorder %s1138_s14, %s851_s9  ;;  %s856_s10 = sshll.u32 %s1014_s26, 4  ;;  %s857_s10 = int_to_ptr.vmem [resolvable:$false] %s856_s10 }
  0x2f   : > { %s858_s5 = scalar_lea.vmem %s857_s10, 256  ;;  %p859_p9 = scmp.lt.s32.totalorder %s1138_s14, %s857_s10 }
  0x30   : > { %p854_p5 = pnand %p852_p3, %p1147_p4  ;;  %p860_p8 = scmp.lt.s32.totalorder %s858_s5, %s851_s9 }
  0x32   : > { %p855_p11 = pneg %p854_p5  ;;  %p861_p7 = por %p860_p8, %p859_p9 }
  0x34   : > { %p862_p10 = pnand %p861_p7, %p855_p11 }
  0x36   : > { %865 = shalt.err (!%p862_p10)
}
  0x37   : > { %766 = dma.hbm_to_vmem [thread:$0]  (!%p1125_p0), %s1134_s12, 128, %s1138_s14, %s1141_s22  }
  0x38   : > { %p1354_p12 = scmp.lt.s32.totalorder %s1012_s20, 3  ;;  %p1355_p1 = scmp.ge.s32.totalorder %s1012_s20, 1 }
  0x39   : > { %s1183_s9 = scalar_lea.hbm %s1329_s0, %s1121_s7  ;;  %s204_s26 = scalar_lea.vmem [#allocation6], %s1118_s6 }
  0x3a   : > { %p1175_p2 = pnand %p1355_p1, %p1354_p12  ;;  %s212_s10 = sshll.u32 %s204_s26, 4  ;;  %s1186_s10 = int_to_ptr.vmem [resolvable:$true] %s212_s10 }
  0x3b   : > { %s1192_s5 = scalar_lea.hbm %s1331_s2, %s1121_s7  ;;  %s1357_s1 = sand.u32 1, %s1000_s17  }
  0x3c   : > { %s1356_s24 = scalar_select %p1175_p2, 1, 0 }
  0x3d   : > { %s201_s23 = scalar_lea.sflag [#allocation7], %s1357_s1  ;;  %s866_s19 = scalar_lea.hbm %s1183_s9, 128 }
  0x3e   : > { %p867_p8 = scmp.ne.s32.totalorder %s1183_s9, %s866_s19  ;;  %s871_s29 = scalar_lea.hbm %s1329_s0, 256 }
  0x3f   : > { %p872_p6 = scmp.lt.u32.totalorder %s1183_s9, %s1329_s0  ;;  %p873_p13 = scmp.lt.u32.totalorder %s871_s29, %s866_s19 }
  0x40   : > { %p869_p9 = pnand %p867_p8, %p1147_p4  ;;  %p875_p5 = scmp.lt.u32.totalorder %s866_s19, %s1183_s9 }
  0x41   : > { %p874_p3 = por %p873_p13, %p872_p6 }
  0x42   : > { %p870_p11 = pneg %p869_p9 }
  0x43   : > { %p876_p7 = por %p875_p5, %p874_p3 }
  0x45   : > { %p877_p10 = pnand %p876_p7, %p870_p11 }
  0x47   : > { %880 = shalt.err (!%p877_p10)
}
  0x48   : > { %s881_s1 = scalar_lea.vmem %s1186_s10, 128  ;;  %s1015_s7 = smov [#allocation6]  }
  0x49   : > { %p882_p12 = scmp.ne.s32.totalorder %s1186_s10, %s881_s1  ;;  %s886_s12 = sshll.u32 %s1015_s7, 4  ;;  %s887_s12 = int_to_ptr.vmem [resolvable:$false] %s886_s12 }
  0x4a   : > { %s888_s20 = scalar_lea.vmem %s887_s12, 256  ;;  %p889_p9 = scmp.lt.s32.totalorder %s1186_s10, %s887_s12 }
  0x4b   : > { %p884_p1 = pnand %p882_p12, %p1147_p4  ;;  %p890_p2 = scmp.lt.s32.totalorder %s888_s20, %s881_s1 }
  0x4d   : > { %p885_p8 = pneg %p884_p1  ;;  %p891_p6 = por %p890_p2, %p889_p9 }
  0x4f   : > { %p892_p13 = pnand %p891_p6, %p885_p8 }
  0x51   : > { %895 = shalt.err (!%p892_p13)
}
  0x52   : > { %763 = dma.hbm_to_vmem [thread:$0]  (!%p1125_p0), %s1183_s9, 128, %s1186_s10, %s201_s23  }
  0x53   : > { %s242_s19 = scalar_lea.vmem [#allocation11], %s1118_s6  ;;  %s896_s14 = scalar_lea.hbm %s1192_s5, 128 }
  0x54   : > { %s250_s29 = sshll.u32 %s242_s19, 4  ;;  %p897_p11 = scmp.ne.s32.totalorder %s1192_s5, %s896_s14  ;;  %s251_s29 = int_to_ptr.vmem [resolvable:$true] %s250_s29 }
  0x55   : > { %s901_s26 = scalar_lea.hbm %s1331_s2, 256  ;;  %p902_p5 = scmp.lt.u32.totalorder %s1192_s5, %s1331_s2 }
  0x56   : > { %p899_p2 = pnand %p897_p11, %p1147_p4  ;;  %p903_p7 = scmp.lt.u32.totalorder %s901_s26, %s896_s14 }
  0x57   : > { %p905_p12 = scmp.lt.u32.totalorder %s896_s14, %s1192_s5 }
  0x58   : > { %p900_p3 = pneg %p899_p2  ;;  %p904_p10 = por %p903_p7, %p902_p5 }
  0x5a   : > { %p906_p1 = por %p905_p12, %p904_p10 }
  0x5c   : > { %p907_p8 = pnand %p906_p1, %p900_p3 }
  0x5e   : > { %910 = shalt.err (!%p907_p8)
}
  0x5f   : > { %s911_s23 = scalar_lea.vmem %s251_s29, 128  ;;  %s1016_s6 = smov [#allocation11]  }
  0x60   : > { %p912_p9 = scmp.ne.s32.totalorder %s251_s29, %s911_s23  ;;  %s916_s9 = sshll.u32 %s1016_s6, 4  ;;  %s917_s9 = int_to_ptr.vmem [resolvable:$false] %s916_s9 }
  0x61   : > { %s918_s10 = scalar_lea.vmem %s917_s9, 256  ;;  %p919_p11 = scmp.lt.s32.totalorder %s251_s29, %s917_s9 }
  0x62   : > { %p914_p6 = pnand %p912_p9, %p1147_p4  ;;  %p920_p2 = scmp.lt.s32.totalorder %s918_s10, %s911_s23 }
  0x64   : > { %p915_p13 = pneg %p914_p6  ;;  %p921_p0 = por %p920_p2, %p919_p11 }
  0x66   : > { %p922_p5 = pnand %p921_p0, %p915_p13 }
  0x68   : > { %925 = shalt.err (!%p922_p5)
}
  0x69   : > { %p1358_p7 = scmp.ne.s32.totalorder %s1351_s8, 0  ;;  %p1359_p3 = scmp.ne.s32.totalorder %s1356_s24, 0 }
  0x6a   : > { %s1239_s25 = sand.u32 (!%p1359_p3), 1, %s996_s16   ;;  %p1360_p0 = scmp.ne.s32.totalorder (!%p1359_p3), %s1347_s27, 0 }
  0x6b   : > { %769 = dma.hbm_to_vmem [thread:$0]  (!%p1358_p7), %s1192_s5, 128, %s251_s29, %s1141_s22  }
  0x6c   : > { %268 = sbr.rel (%p1359_p3) target bundleno = 944 (0x3b0), region = 36  ;;  %s1242_s12 = sshll.u32 (!%p1359_p3), %s1239_s25, 3 }
  0x6d   : > { %s271_s20 = scalar_lea.sflag (!%p1359_p3), [#allocation7], %s1239_s25  ;;  %s274_s19 = scalar_lea.vmem (!%p1359_p3), [#allocation6], %s1242_s12 }
  0x73   : > { %979 = dma.done.wait (%p1360_p0), %s271_s20, 128  }
  0x74   : > { %981 = vsyncadd (%p1360_p0), %s271_s20, 4294967168  ;;  %s279_s8 = sand.u32 1, %s1078_s21   ;;  %s283_s24 = scalar_lea.vmem [#allocation9], %s1242_s12 }
  0x75   : > { %s280_s22 = scalar_lea.sflag [#allocation10], %s279_s8 }
  0x76   : > { %983 = dma.done.wait (%p1360_p0), %s280_s22, 256  }
  0x77   : > { %985 = vsyncadd (%p1360_p0), %s280_s22, 4294967040  ;;  %vm347_vm0 = vcmask 261120   ;;  %v1017_v0 = vmov 0.0   ;;  %vm1018_vm1 = vmmov 0   ;;  %v349_v1 = vld [vmem:[%s274_s19] sm:$0xff]  ;;  %v353_v2 = vld [vmem:[%s283_s24] sm:$0xff] }
  0x78   : > { %742 = vmatprep.subr.mxu0 %v1017_v0  ;;  %348 = vst.msk [vmem:[#allocation4] sm:$0xff] %vm347_vm0, %v1017_v0  ;;  %744 = vmatprep.mubr.msk.f32.mxu0 %vm1018_vm1, %v1017_v0  ;;  %v350_v3 = vmul.f32 0.25503486, %v349_v1  ;;  %vm344_vm2 = vcmask 7168   ;;  %v1019_v5 = vmov -inf   ;;  %p333_p4 = scmp.lt.s32.totalorder %s1004_s18, 1 }
  0x79   : > { %747 = vmatprep.subr.mxu1 %v1017_v0  ;;  %749 = vmatprep.mubr.msk.f32.mxu1 %vm1018_vm1, %v1017_v0  ;;  %345 = vst.msk [vmem:[#allocation2] sm:$0xff] %vm344_vm2, %v1019_v5  ;;  %346 = vst.msk [vmem:[#allocation3] sm:$0xff] %vm344_vm2, %v1017_v0  ;;  %vm439_vm3 = vcmask 64512   ;;  %v1020_v11 = vmov 0   ;;  %s292_s14 = scalar_lea.vmem [#allocation11], %s1242_s12  ;;  %s735_s11 = sshll.u32 %s1004_s18, 7 }
  0x7a   : > { %743 = vmatpush3.xpose.msk.msra.mxu0 %vm347_vm0, %v353_v2  ;;  %351 = vst.msk [vmem:[#allocation5] sm:$0xff] %vm347_vm0, %v350_v3  ;;  %s334_s21 = scalar_select %p333_p4, %s1004_s18, 1  ;;  %828 = vset.pattern.permute.xlu0 %v1020_v11  ;;  %v354_v16 = vld [vmem:[%s292_s14] sm:$0xff] }
  0x7b   : > { %829 = vset.pattern.permute.xlu1 %v1020_v11  ;;  %748 = vmatpush3.msra.mxu1 %v354_v16  ;;  %s332_s13 = scalar_lea.vmem [#allocation12], %s1242_s12  ;;  %s1279_s23 = scalar_lea.hbm %s1333_s4, %s735_s11 }
  0x7c   : > { %s338_s29 = scalar_lea.vmem %s1332_s3, %s334_s21  ;;  %s575_s26 = sshll.u32 %s332_s13, 4  ;;  %s1281_s26 = int_to_ptr.vmem [resolvable:$true] %s575_s26 }
  0x7d   : > { %v730_v6 = vld [vmem:[%s338_s29] ss:$0 sm:$0xff]  ;;  %s561_s6 = scalar_lea.sflag [#allocation8], %s1239_s25  ;;  %s926_s9 = scalar_lea.vmem %s1281_s26, 128 }
  0x7e   : > { %p927_p10 = scmp.ne.s32.totalorder %s1281_s26, %s926_s9  ;;  %p1361_p12 = scmp.ne.s32.totalorder %s1348_s28, 0 }
  0x7f   : > { %v461_v31 = vld [vmem:[#allocation4] sm:$0xff]  ;;  %s1021_s18 = smov [#allocation12]  }
  0x80   : > { %v438_v12 = vld [vmem:[#allocation2] sm:$0xff]  ;;  %v453_v22 = vld [vmem:[#allocation3] sm:$0xff]  ;;  %p928_p1 = pnand %p927_p10, %p1361_p12  ;;  %s930_s10 = sshll.u32 %s1021_s18, 4  ;;  %s931_s10 = int_to_ptr.vmem [resolvable:$false] %s930_s10 }
  0x81   : > { %v352_v4 = vld [vmem:[#allocation5] sm:$0xff]  ;;  %s932_s12 = scalar_lea.vmem %s931_s10, 256  ;;  %p933_p9 = scmp.lt.s32.totalorder %s1281_s26, %s931_s10 }
  0x82   : > { %745 = vmatmul.mubr.msk.f32.vlgmr.msra.gmra.mrb[0].mxu0 %vm347_vm0, %v352_v4  ;;  %p929_p8 = pneg %p928_p1  ;;  %p934_p6 = scmp.lt.s32.totalorder %s932_s12, %s926_s9 }
  0x84   : > { %p935_p13 = por %p934_p6, %p933_p9 }
  0x86   : > { %p936_p11 = pnand %p935_p13, %p929_p8 }
 0x155   : > { %v434_v7 = vpop.f32.mrb[0].mxu0 }
 0x156   : > { %v435_v8 = vadd.f32 %v730_v6, %v434_v7  ;;  %v746_v9 = vpop.f32.mrb[1].mxu0 }
 0x158   : > { %v440_v10 = vsel %vm439_vm3, %v435_v8, -inf }
 0x159   : > { %441 = vmax.xlane.f32.xlu0 %v440_v10 }
 0x1e6   : > { %v442_v13 = vpop.xlane.xlu0 %441 }
 0x1e7   : > { %v443_v14 = vmax.f32 %v438_v12, %v442_v13 }
 0x1e9   : > { %v444_v15 = vsub.f32 %v438_v12, %v443_v14  ;;  %543 = vst.msk [vmem:[#allocation2] sm:$0xff] %vm344_vm2, %v443_v14  ;;  %448 = vperm.xlu0 %828, %v443_v14  }
 0x268   : > { %v449_v17 = vpop.permute.xlu0 %448 }
 0x269   : > { %v451_v18 = vsub.f32 %v435_v8, %v449_v17 }
 0x26b   : > { %830 = vpow2.f32 %v451_v18 }
 0x26c   : > { %832 = vpow2.f32 %v444_v15 }
 0x275   : > { %v831_v19 = vpop.eup %830 }
 0x276   : > { %750 = vmatmul.mubr.msk.f32.vlgmr.msra.gmra.mrb[0].mxu1 %vm439_vm3, %v831_v19  ;;  %v455_v20 = vsel %vm439_vm3, %v831_v19, 0.0  ;;  %v833_v21 = vpop.eup %832 }
 0x277   : > { %456 = vadd.xlane.f32.xlu1 %v455_v20  ;;  %v454_v23 = vmul.f32 %v833_v21, %v453_v22 }
 0x288   : > { %464 = vperm.xlu1 %829, %v833_v21  }
 0x304   : > { %v457_v24 = vpop.xlane.xlu1 %456 }
 0x305   : > { %v458_v25 = vadd.f32 %v457_v24, %v454_v23 }
 0x307   : > { %460 = vst.msk [vmem:[#allocation3] sm:$0xff] %vm344_vm2, %v458_v25 }
 0x308   : > { %v465_v32 = vpop.permute.xlu1 %464 }
 0x309   : > { %v467_v33 = vmul.f32 %v465_v32, %v461_v31 }
 0x30e   : > { %v547_v26 = vld [vmem:[#allocation3] sm:$0xff] }
 0x30f   : > { %834 = vrcp.f32 %v547_v26 }
 0x319   : > { %v835_v27 = vpop.eup %834 }
 0x31a   : > { %v549_v28 = vmul.f32 %v835_v27, %v547_v26 }
 0x31c   : > { %v550_v29 = vsub.f32 2.0, %v549_v28 }
 0x31e   : > { %v551_v30 = vmul.f32 %v835_v27, %v550_v29 }
 0x320   : > { %555 = vperm.xlu1 %829, %v551_v30  }
 0x349   : > { %v537_v34 = vpop.f32.mrb[0].mxu1 }
 0x34a   : > { %v541_v35 = vadd.f32 %v537_v34, %v467_v33  ;;  %v751_v36 = vpop.f32.mrb[1].mxu1 }
 0x34c   : > { %542 = vst.msk [vmem:[#allocation4] sm:$0xff] %vm347_vm0, %v541_v35 }
 0x353   : > { %v552_v37 = vld [vmem:[#allocation4] sm:$0xff] }
 0x39f   : > { %v556_v38 = vpop.permute.xlu1 %555 }
 0x3a0   : > { %v558_v39 = vmul.f32 %v556_v38, %v552_v37 }
 0x3a2   : > { %559 = vst.msk [vmem:[%s332_s13] sm:$0xff] %vm347_vm0, %v558_v39 }
 0x3a3   : > { %939 = shalt.err (!%p936_p11)
}
 0x3a4   : > { %s940_s25 = scalar_lea.hbm %s1279_s23, 128  ;;  %s944_s8 = scalar_lea.hbm %s1333_s4, 256 }
 0x3a5   : > { %p941_p2 = scmp.ne.s32.totalorder %s1279_s23, %s940_s25  ;;  %p945_p3 = scmp.lt.u32.totalorder %s1279_s23, %s1333_s4 }
 0x3a6   : > { %p946_p0 = scmp.lt.u32.totalorder %s944_s8, %s940_s25  ;;  %p948_p10 = scmp.lt.u32.totalorder %s940_s25, %s1279_s23 }
 0x3a7   : > { %p942_p5 = pnand %p941_p2, %p1361_p12 }
 0x3a8   : > { %p947_p4 = por %p946_p0, %p945_p3 }
 0x3a9   : > { %p943_p7 = pneg %p942_p5 }
 0x3aa   : > { %p949_p1 = por %p948_p10, %p947_p4 }
 0x3ac   : > { %p950_p8 = pnand %p949_p1, %p943_p7 }
 0x3ae   : > { %953 = shalt.err (!%p950_p8)
}
 0x3af   : > { %758 = dma.vmem_to_hbm [thread:$0]  (%p1361_p12), %s1281_s26, 128, %s1279_s23, %s561_s6  }
 0x3b0 PF: > { %s1362_s21 = sld [smem:[#allocation17_spill]]  ;;  %s587_s27 = sand.u32 1, %s992_s15  }
 0x3b1   : > { %p1363_p9 = scmp.ne.s32.totalorder %s1350_s30, 0  ;;  %s588_s5 = scalar_lea.sflag [#allocation8], %s587_s27 }
 0x3b6   : > { %p1364_p6 = scmp.ge.s32.totalorder %s1362_s21, 2 }
 0x3b8   : > { %p771_p13 = pnand %p1364_p6, %p1363_p9 }
 0x3ba   : > { %987 = dma.done.wait (!%p771_p13), %s588_s5, 128  }
 0x3bb   : > { %989 = vsyncadd (!%p771_p13), %s588_s5, 4294967168  ;;  %s23_s20 = sadd.s32 1, %s1362_s21   ;;  %s1365_s28 = sld [smem:[#allocation19_spill]] }
 0x3bc   : > { %p20_p11 = scmp.ge.s32.totalorder %s23_s20, 4   ;;  %s1366_s18 = sld [smem:[#allocation16_spill]] }
 0x3bd   : > { %s1367_s19 = sld [smem:[#allocation18_spill]]  ;;  %s1368_s15 = smov %s996_s16 }
 0x3be   : > { %s1369_s16 = smov %s1000_s17  ;;  %22 = sbr.rel (!%p20_p11) target bundleno = 10 (0xa), region = 116 }
 0x3c1   : > { %s1370_s17 = smov %s1365_s28 }
 0x3c5   :  { %593 = vsyncpa [#allocation7], 1 }
 0x3c6   :  { %595 = vsyncpa [#allocation7 + $0x1], 1 }
 0x3c7   :  { %596 = vsyncpa [#allocation10], 1 }
 0x3c8   :  { %598 = vsyncpa [#allocation10 + $0x1], 1 }
 0x3c9   :  { %599 = vsyncpa [#allocation8], 1 }
 0x3ca   :  { %601 = vsyncpa [#allocation8 + $0x1], 1 }

</bundles_post_ra>
